<compile_context>
chip_gen: v7x
topology: tpu7x:2x2x1
jax: 0.10.0
libtpu: 0.0.40
codegen_flags: <defaults>
</compile_context>

<pallas_src>
import functools

import jax
import jax.numpy as jnp
from jax import lax
from jax.experimental import pallas as pl
from jax.experimental.pallas import tpu as pltpu


@functools.partial(jax.jit, static_argnames=("stride", "Ls", "compute_dtype"))
def isac_dual_forward(x, kr, ki, dr, di, *, stride, Ls,
                      compute_dtype=jnp.float32):
    """Pallas implementation of ISACDual.forward.

    x: (B, L) f32, kr/ki: (F, K) analysis kernels, dr/di: (F, K) decoder
    kernels.  Returns (B, Ls) f32.

    compute_dtype=jnp.bfloat16 halves the input-window DMA bytes and runs the
    MXU at native bf16 rate (f32 accumulation), at the cost of quantizing the
    input signal (~1e-2 relative error vs the f32 PyTorch forward).
    """
    B, L = x.shape
    F, K = kr.shape
    d = stride
    p = K // 2

    # ---------------- glue: circular padding (index plumbing) --------------
    x = x.astype(compute_dtype)
    xp = jnp.concatenate([x[:, L - p:], x, x[:, :p]], axis=1)        # (B, Lp)
    Lp = L + 2 * p
    T = (Lp - K) // d + 1                                            # conv1d frames

    # conv_transpose1d geometry: PyTorch requires 0 <= output_padding < stride;
    # the overlap-add below matches it under the same constraint.
    op = Ls - (T - 1) * d + 2 * p - K
    assert 0 <= op < max(d, 1), (
        f"invalid conv_transpose1d geometry: output_padding={op}, stride={d}")

    # ---------------- fused weights (tiny, resident in VMEM) ---------------
    m_eff = (kr.astype(jnp.float32).T @ dr.astype(jnp.float32)
             + ki.astype(jnp.float32).T @ di.astype(jnp.float32))    # (K, K)

    Q_r = -(-K // d)                 # analysis taps per frame, in d-chunks
    Kr_pad = Q_r * d
    s_sh = -(-p // d)                # frame shift of the overlap-add
    delta = s_sh * d - p             # left zero-pad of the synthesis-tap axis
    Q_c = -(-(K + delta) // d)       # output d-chunks written per frame
    Kc_pad = Q_c * d
    m2 = jnp.zeros((Kr_pad, Kc_pad), jnp.float32)
    m2 = m2.at[:K, delta:delta + K].set(m_eff)
    m2 = m2.astype(compute_dtype)    # built directly in compute dtype (no big cast)

    # ---------------- output tiling over the frame-rate (u) axis -----------
    # Output is produced as (B, U, d) rows of width d; flattened/cropped in glue.
    U_full = -(-Ls // d)
    U_cap = max(8, 8192 // max(d, 1))            # ~8K output samples per tile
    if U_full <= 8:
        U_t = U_full                             # single tile == full dim
    else:
        half = -(-U_full // 2)
        U_t = min(U_cap, ((half + 7) // 8) * 8)  # multiple of 8 sublanes and
                                                 # >= 2 tiles -> both v7x TCs busy
    num_tiles = -(-U_full // U_t)
    U_tot = num_tiles * U_t

    Tb = U_t + Q_c - 1               # frames contributing to one output tile
    Wd = U_t + Q_c + Q_r - 2         # signal window rows (of width d) per tile
    t0_base = s_sh - Q_c + 1         # first frame of tile 0 (may be negative)

    # ---------------- glue: haloed per-tile signal windows ------------------
    # Halo duplication is only (Q_r+Q_c-2)*d samples per tile (~1.0x signal),
    # replacing the old K/d-duplicating frame gather.
    # TODO(synk): a pl.Element-offset BlockSpec on the window axis would remove
    # even this small duplication; kept as a materialized gather for robustness.
    padL_d = max(0, -t0_base)
    base_d = t0_base + padL_d
    need_d = (num_tiles - 1) * U_t + base_d + Wd
    Lp_d = -(-Lp // d)
    Le_d = max(need_d, padL_d + Lp_d)
    xp_ext = jnp.pad(xp, ((0, 0), (padL_d * d, Le_d * d - padL_d * d - Lp)))
    xe3 = xp_ext.reshape(B, Le_d, d)
    row_idx = (base_d + jnp.arange(num_tiles)[:, None] * U_t
               + jnp.arange(Wd)[None, :])                            # (nt, Wd)
    xwin = jnp.moveaxis(jnp.take(xe3, row_idx, axis=1), 1, 0)        # (nt, B, Wd, d)

    # ---------------- the kernel -------------------------------------------
    def kernel(xwin_ref, m2_ref, out_ref):
        tj = pl.program_id(0)
        xw = xwin_ref[0]                                   # (B, Wd, d)

        # frames(B*Tb, Kr_pad) @ m2(Kr_pad, Kc_pad) without materializing
        # frames: Q_r shifted d-wide slices of the window, each contracted
        # with the matching d rows of m2.  MXU M-dim is B*Tb, not B.
        acc = jnp.zeros((B, Tb, Kc_pad), jnp.float32)
        for q in range(Q_r):
            acc += jnp.einsum(
                "btd,dc->btc",
                xw[:, q:q + Tb, :],
                m2_ref[q * d:(q + 1) * d, :],
                preferred_element_type=jnp.float32)

        # Mask frames that fall before frame 0 / after frame T-1 of conv1d
        # (only relevant for boundary tiles; same code path everywhere).
        t_loc = lax.broadcasted_iota(jnp.int32, (Tb, 1), 0)
        t_glob = t_loc + (tj * U_t + t0_base)
        valid = jnp.logical_and(t_glob >= 0, t_glob < T)   # (Tb, 1)
        acc = jnp.where(valid[None, :, :], acc, 0.0)

        # Strided overlap-add of the conv_transpose: output row u receives the
        # q-th d-chunk of frame (u + s_sh - q)  ->  Q_c static sublane-shifted
        # adds; no gathers / lane reshapes.  (Store is d lanes wide; the final
        # lane-dense flatten to (B, Ls) happens for free in glue.)
        y = jnp.zeros((B, U_t, d), jnp.float32)
        for q in range(Q_c):
            off = Q_c - 1 - q
            y = y + acc[:, off:off + U_t, q * d:(q + 1) * d]
        out_ref[...] = y.astype(out_ref.dtype)

    # ---------------- VMEM budget (v7x: 64 MiB physical, 32 MiB default) ----
    itemsize = jnp.dtype(compute_dtype).itemsize
    vmem_est = (2 * B * Wd * d * itemsize          # xwin block, double-buffered
                + 2 * B * U_t * d * 4              # out block, double-buffered
                + 2 * Kr_pad * Kc_pad * itemsize   # resident fused weights
                + 3 * B * Tb * Kc_pad * 4)         # acc / temporaries
    vmem_limit = int(min(48 * 2 ** 20, max(32 * 2 ** 20, 4 * vmem_est)))

    out = pl.pallas_call(
        kernel,
        out_shape=jax.ShapeDtypeStruct((B, U_tot, d), jnp.float32),
        grid_spec=pltpu.PrefetchScalarGridSpec(
            num_scalar_prefetch=0,
            grid=(num_tiles,),
            in_specs=[
                pl.BlockSpec((1, B, Wd, d), lambda j: (j, 0, 0, 0)),   # per-tile window
                pl.BlockSpec((Kr_pad, Kc_pad), lambda j: (0, 0)),      # resident weights
            ],
            out_specs=pl.BlockSpec((B, U_t, d), lambda j: (0, j, 0)),
        ),
        compiler_params=pltpu.CompilerParams(
            dimension_semantics=("parallel",),
            vmem_limit_bytes=vmem_limit),
    )(xwin, m2)

    return out.reshape(B, U_tot * d)[:, :Ls]


def reference_forward(x, kr, ki, dr, di, *, stride, Ls):
    """Pure-JAX (lax.conv) reference matching the PyTorch forward semantics."""
    B, L = x.shape
    F, K = kr.shape
    p = K // 2
    d = stride
    xp = jnp.concatenate([x[:, L - p:], x, x[:, :p]], axis=1)[:, None, :]  # (B,1,Lp)
    dn = ("NCH", "OIH", "NCH")
    cr = lax.conv_general_dilated(xp, kr[:, None, :], (d,), "VALID",
                                  dimension_numbers=dn)                 # (B, F, T)
    ci = lax.conv_general_dilated(xp, ki[:, None, :], (d,), "VALID",
                                  dimension_numbers=dn)
    T = cr.shape[-1]
    op = Ls - (T - 1) * d + 2 * p - K                                   # output_padding

    def tconv(c, w):  # conv_transpose1d(stride=d, padding=p, output_padding=op)
        w2 = jnp.flip(jnp.transpose(w[:, None, :], (1, 0, 2)), axis=-1)  # (1, F, K)
        return lax.conv_general_dilated(
            c, w2, (1,), [(K - 1 - p, K - 1 - p + op)],
            lhs_dilation=(d,), dimension_numbers=dn)

    y = tconv(cr, dr) + tconv(ci, di)
    return y[:, 0, :]


if __name__ == "__main__":
    # Small shapes consistent with the module: batch=2, signal length 128,
    # 8 complex filters of length 16, stride 8, Ls = original length.
    B, L, F, K, d = 2, 128, 8, 16, 8
    Ls = L

    key = jax.random.PRNGKey(0)
    k1, k2, k3 = jax.random.split(key, 3)
    kernels_real = jax.random.normal(k1, (F, K), jnp.float32) / jnp.sqrt(K)
    kernels_imag = jax.random.normal(k2, (F, K), jnp.float32) / jnp.sqrt(K)
    # decoder params initialize to real/imag of the complex kernels (per __init__)
    decoder_real = kernels_real
    decoder_imag = kernels_imag

    x = jax.random.normal(k3, (B, L), jnp.float32)

    y_ref = reference_forward(x, kernels_real, kernels_imag,
                              decoder_real, decoder_imag, stride=d, Ls=Ls)

    y = isac_dual_forward(x, kernels_real, kernels_imag,
                          decoder_real, decoder_imag, stride=d, Ls=Ls)
    y = jax.block_until_ready(y)
    assert y.shape == (B, Ls), y.shape
    max_err = float(jnp.max(jnp.abs(y - y_ref)))
    if not bool(jnp.allclose(y, y_ref, rtol=2e-3, atol=2e-3)):
        raise AssertionError(f"Pallas kernel mismatch vs reference, max|err|={max_err}")

    print("KERNEL_OK")
</pallas_src>

<mosaic_0001>
module attributes {stable_mosaic.version = 11 : i64} {
  func.func @kernel(%arg0: i32, %arg1: memref<1x2x10x8xf32, #tpu.memory_space<vmem>>, %arg2: memref<16x16xf32, #tpu.memory_space<vmem>>, %arg3: memref<2x8x8xf32, #tpu.memory_space<vmem>>) attributes {dimension_semantics = [#tpu.dimension_semantics<parallel>], iteration_bounds = array<i64: 2>, scalar_prefetch = 0 : i64, scratch_operands = 0 : i64, tpu.core_type = #tpu.core_type<tc>, window_params = [{transform_indices = @transform_0, window_bounds = array<i64: 1, 2, 10, 8>}, {pipeline_mode = #tpu.pipeline_mode<synchronous>, transform_indices = @transform_1, window_bounds = array<i64: 16, 16>}, {transform_indices = @transform_2, window_bounds = array<i64: 2, 8, 8>}]} {
    %c0 = arith.constant 0 : index
    %c0_0 = arith.constant 0 : index
    %c0_1 = arith.constant 0 : index
    %c0_2 = arith.constant 0 : index
    %0 = vector.load %arg1[%c0, %c0_0, %c0_1, %c0_2] : memref<1x2x10x8xf32, #tpu.memory_space<vmem>>, vector<1x2x10x8xf32>
    %1 = vector.shape_cast %0 : vector<1x2x10x8xf32> to vector<2x10x8xf32>
    %cst = arith.constant 0.000000e+00 : f32
    %2 = vector.broadcast %cst : f32 to vector<2x9x16xf32>
    %3 = vector.extract_strided_slice %1 {offsets = [0, 0, 0], sizes = [2, 9, 8], strides = [1, 1, 1]} : vector<2x10x8xf32> to vector<2x9x8xf32>
    %c0_3 = arith.constant 0 : index
    %c0_4 = arith.constant 0 : index
    %4 = vector.load %arg2[%c0_3, %c0_4] : memref<16x16xf32, #tpu.memory_space<vmem>>, vector<8x16xf32>
    "tpu.trace_start"() <{level = 10 : i32, message = "btd,dc->btc"}> : () -> ()
    %cst_5 = arith.constant dense<0.000000e+00> : vector<2x9x16xf32>
    %5 = tpu.matmul %3, %4, %cst_5 {dimension_numbers = #tpu.dot_dimension_numbers<[2], [0], [0, 1], [1], [0, 0, 0, 1, 1, 1], [], []>} : vector<2x9x8xf32>, vector<8x16xf32>, vector<2x9x16xf32> -> vector<2x9x16xf32>
    "tpu.trace_stop"() : () -> ()
    %6 = arith.addf %2, %5 : vector<2x9x16xf32>
    %7 = vector.extract_strided_slice %1 {offsets = [0, 1, 0], sizes = [2, 9, 8], strides = [1, 1, 1]} : vector<2x10x8xf32> to vector<2x9x8xf32>
    %c8 = arith.constant 8 : index
    %c0_6 = arith.constant 0 : index
    %8 = vector.load %arg2[%c8, %c0_6] : memref<16x16xf32, #tpu.memory_space<vmem>>, vector<8x16xf32>
    "tpu.trace_start"() <{level = 10 : i32, message = "btd,dc->btc"}> : () -> ()
    %cst_7 = arith.constant dense<0.000000e+00> : vector<2x9x16xf32>
    %9 = tpu.matmul %7, %8, %cst_7 {dimension_numbers = #tpu.dot_dimension_numbers<[2], [0], [0, 1], [1], [0, 0, 0, 1, 1, 1], [], []>} : vector<2x9x8xf32>, vector<8x16xf32>, vector<2x9x16xf32> -> vector<2x9x16xf32>
    "tpu.trace_stop"() : () -> ()
    %10 = arith.addf %6, %9 : vector<2x9x16xf32>
    %11 = tpu.iota {dimensions = array<i32: 0>} : vector<9x1xi32>
    %c8_i32 = arith.constant 8 : i32
    %12 = arith.muli %arg0, %c8_i32 : i32
    %c0_i32 = arith.constant 0 : i32
    %13 = arith.addi %12, %c0_i32 : i32
    %14 = vector.broadcast %13 : i32 to vector<9x1xi32>
    %15 = arith.addi %11, %14 : vector<9x1xi32>
    %c0_i32_8 = arith.constant 0 : i32
    %16 = vector.broadcast %c0_i32_8 : i32 to vector<9x1xi32>
    %17 = arith.cmpi sge, %15, %16 : vector<9x1xi32>
    %c17_i32 = arith.constant 17 : i32
    %18 = vector.broadcast %c17_i32 : i32 to vector<9x1xi32>
    %19 = arith.cmpi slt, %15, %18 : vector<9x1xi32>
    %20 = arith.andi %17, %19 : vector<9x1xi1>
    %21 = vector.shape_cast %20 : vector<9x1xi1> to vector<1x9x1xi1>
    %cst_9 = arith.constant 0.000000e+00 : f32
    %22 = vector.shape_cast %21 : vector<1x9x1xi1> to vector<1x9x1xi1>
    %23 = vector.broadcast %22 : vector<1x9x1xi1> to vector<2x9x16xi1>
    %24 = vector.broadcast %cst_9 : f32 to vector<2x9x16xf32>
    %25 = arith.select %23, %10, %24 : vector<2x9x16xi1>, vector<2x9x16xf32>
    %cst_10 = arith.constant 0.000000e+00 : f32
    %26 = vector.broadcast %cst_10 : f32 to vector<2x8x8xf32>
    %27 = vector.extract_strided_slice %25 {offsets = [0, 1, 0], sizes = [2, 8, 8], strides = [1, 1, 1]} : vector<2x9x16xf32> to vector<2x8x8xf32>
    %28 = arith.addf %26, %27 : vector<2x8x8xf32>
    %29 = vector.extract_strided_slice %25 {offsets = [0, 0, 8], sizes = [2, 8, 8], strides = [1, 1, 1]} : vector<2x9x16xf32> to vector<2x8x8xf32>
    %30 = arith.addf %28, %29 : vector<2x8x8xf32>
    %c0_11 = arith.constant 0 : index
    %c0_12 = arith.constant 0 : index
    %c0_13 = arith.constant 0 : index
    %31 = vector.load %arg3[%c0_11, %c0_12, %c0_13] : memref<2x8x8xf32, #tpu.memory_space<vmem>>, vector<2x8x8xf32>
    tpu.vector_store %arg3[%c0_11, %c0_12, %c0_13], %30 {strides = array<i32>} : memref<2x8x8xf32, #tpu.memory_space<vmem>>, vector<2x8x8xf32>,
    return
  }
  func.func @transform_0(%arg0: i32) -> (i32, i32, i32, i32) {
    %c0_i32 = arith.constant 0 : i32
    %c0_i32_0 = arith.constant 0 : i32
    %c0_i32_1 = arith.constant 0 : i32
    %c0_i32_2 = arith.constant 0 : i32
    return %arg0, %c0_i32, %c0_i32_0, %c0_i32_1 : i32, i32, i32, i32
  }
  func.func @transform_1(%arg0: i32) -> (i32, i32) {
    %c0_i32 = arith.constant 0 : i32
    %c0_i32_0 = arith.constant 0 : i32
    %c0_i32_1 = arith.constant 0 : i32
    return %c0_i32, %c0_i32_0 : i32, i32
  }
  func.func @transform_2(%arg0: i32) -> (i32, i32, i32) {
    %c0_i32 = arith.constant 0 : i32
    %c0_i32_0 = arith.constant 0 : i32
    %c0_i32_1 = arith.constant 0 : i32
    return %c0_i32, %arg0, %c0_i32_0 : i32, i32, i32
  }
}

</mosaic_0001>

<bundles_post_ra>
// kernel: isac_dual_forward.1
= control target key start
LH: loop header
LB: loop body
LE: loop exit
PB: predicated region body
PF: predicated region fallthrough
CT: control target
= control target key end

     0   :  { %s1216_s9 = smov 0   ;;  %s1218_s10 = smov 0   ;;  %s1418_s0 = inlined_call_operand.vmem [shape: f32[2,2,10,8], index: 0, kind: input, shape index: {}]   ;;  %s1419_s1 = inlined_call_operand.vmem [shape: f32[16,16], index: 1, kind: input, shape index: {}]   ;;  %s1420_s2 = inlined_call_operand.vmem [shape: f32[2,16,8], index: 2, kind: output, shape index: {}]  }
   0x1   :  { %s1220_s11 = smov 0  }
   0x2 LB: > { %s1229_s12 = sadd.s32 4294967295, %s1195_s11   ;;  %s1231_s13 = sadd.s32 1, %s1195_s11   ;;  %s1195_s11 = sphi %s1220_s11, %s1428_s11   ;;  %s1191_s10 = sphi %s1218_s10, %s1427_s10   ;;  %s1187_s9 = sphi %s1216_s9, %s1426_s9  }
   0x3   : > { %s63_s14 = ssub.s32 %s1195_s11, %s1231_s13  ;;  %s66_s15 = sadd.s32 1, %s1191_s10 }
   0x4   : > { %p64_p0 = scmp.eq.s32.totalorder %s63_s14, 0  ;;  %p76_p1 = scmp.ne.s32.totalorder %s1191_s10, %s1187_s9 }
   0x5   : > { %p77_p2 = scmp.eq.s32.totalorder %s1229_s12, 1  ;;  %p1086_p3 = scmp.ge.s32.totalorder %s1195_s11, 1 }
   0x6   : > { %s1239_s16 = scalar_select %p64_p0, %s1191_s10, %s66_s15  }
   0x7   : > { %p1241_p4 = por %p77_p2, %p76_p1  ;;  %p112_p5 = scmp.lt.s32.totalorder %s1195_s11, 3 }
   0x9   : > { %p113_p6 = pnand %p1086_p3, %p112_p5 }
   0xa   : > { %v142_v0 = vld [vmem:[%s1419_s1] sm:$0xff] (!%p113_p6)  ;;  %v143_v1 = vld [vmem:[%s1419_s1 + $0x8] sm:$0xff] (!%p113_p6)  ;;  %p133_p7 = scmp.lt.s32.totalorder (!%p113_p6), %s1229_s12, 1  ;;  %v152_v2 = vlaneseq (!%p113_p6)  ;;  %v1197_v3 = vmov (!%p113_p6), 0.0   ;;  %vm1198_vm0 = vmmov (!%p113_p6), 0   ;;  %vm403_vm1 = vcmask (!%p113_p6), 64512  }
   0xb   : > { %116 = sbr.rel (%p113_p6) target bundleno = 414 (0x19e), region = 28  ;;  %1129 = vmatprep.subr.mxu0 (!%p113_p6), %v1197_v3  ;;  %1118 = vmatprep.subr.mxu1 (!%p113_p6), %v1197_v3  ;;  %v1199_v4 = vmov (!%p113_p6), 1966171168   ;;  %s1102_s27 = sshll.u32 (!%p113_p6), %s1229_s12, 3  ;;  %vm981_vm8 = vcmask (!%p113_p6), 64513   ;;  %vm983_vm9 = vcmask (!%p113_p6), 57344  }
   0xc   : > { %1130 = vmatpush3.msra.mxu0 (!%p113_p6), %v142_v0  ;;  %1131 = vmatprep.mubr.msk.f32.mxu0 (!%p113_p6), %vm1198_vm0, %v1197_v3  ;;  %v150_v5 = vunpack.c.l.s4 (!%p113_p6), %v1199_v4  ;;  %v1257_v6 = vshrl.u32 (!%p113_p6), %v152_v2, 7  ;;  %s1200_s28 = smov (!%p113_p6), 120   ;;  %s130_s29 = sand.u32 (!%p113_p6), 1, %s1187_s9  }
   0xd   : > { %1119 = vmatpush3.msra.mxu1 (!%p113_p6), %v143_v1  ;;  %1120 = vmatprep.mubr.msk.f32.mxu1 (!%p113_p6), %vm1198_vm0, %v1197_v3  ;;  %s1087_s30 = sshll.u32 (!%p113_p6), %s130_s29, 4 }
   0xe   : > { %v151_v7 = vunpack.c.0.s8 (!%p113_p6), %v150_v5  ;;  %s132_s3 = scalar_lea.vmem (!%p113_p6), [#allocation2], %s1087_s30 }
  0x10   : > { %v1265_v9 = vsub.s32 (!%p113_p6), %v151_v7, %v1257_v6 }
  0x12   : > { %s134_s22 = scalar_select %p133_p7, %s1229_s12, 1 }
  0x13   : > { %s995_s6 = scalar_lea.vmem (%p1241_p4), %s1420_s2, %s1102_s27 }
  0x14   : > { %s1109_s23 = sshll.u32 %s134_s22, 5 }
  0x15   : > { %s137_s26 = scalar_lea.vmem %s1418_s0, %s1109_s23 }
  0x16   : > { %v138_v8 = vld [vmem:[%s137_s26] sm:$0xff]  ;;  %v1090_v10 = vld.sshfl [vmem:[%s137_s26 + $0x8] sm:$0x11 pattern:$0x75316420]  ;;  %v140_v11 = vld [vmem:[%s137_s26 + $0x10] sm:$0xff] }
  0x17   : > { %v148_v12 = vcombine.high %v138_v8, %v138_v8  ;;  %v219_v13 = vcombine.high %v140_v11, %v140_v11  ;;  %v204_v14 = vcombine.high %v1090_v10, %v1090_v10  ;;  %v1267_v15 = vld.sshfl [vmem:[%s137_s26 + $0x18] sm:$0x11 pattern:$0x75316420]  ;;  %v155_v16 = vrot.slane %v138_v8, %v1265_v9 }
  0x18   : > { %v211_v17 = vrot.slane %v1090_v10, %v1265_v9  ;;  %v226_v18 = vrot.slane %v140_v11, %v1265_v9  ;;  %v275_v19 = vcombine.high %v1267_v15, %v1267_v15  ;;  %v1279_v23 = vrot.slane %v1267_v15, %v1265_v9 }
  0x19   : > { %v162_v20 = vrot.slane %v148_v12, %v1265_v9  ;;  %v233_v21 = vrot.slane %v219_v13, %v1265_v9  ;;  %v218_v22 = vrot.slane %v204_v14, %v1265_v9  ;;  %v163_v24 = vcombine.high %v155_v16, %v155_v16 }
  0x1a   : > { %v171_v25 = vrot.slane %v155_v16, %v1265_v9  ;;  %v234_v26 = vcombine.high %v226_v18, %v226_v18  ;;  %v242_v27 = vrot.slane %v226_v18, %v1265_v9 }
  0x1b   : > { %v164_v28 = vcombine.high %v162_v20, %v162_v20  ;;  %v178_v29 = vrot.slane %v162_v20, %v1265_v9  ;;  %v235_v30 = vcombine.high %v233_v21, %v233_v21  ;;  %v249_v31 = vrot.slane %v233_v21, %v1265_v9 }
  0x1c   : > { %v185_v32 = vrot.slane %v163_v24, %v1265_v9  ;;  %v193_v33 = vcombine.high %v171_v25, %v171_v25  ;;  %v256_v34 = vrot.slane %v234_v26, %v1265_v9  ;;  %v264_v35 = vcombine.high %v242_v27, %v242_v27 }
  0x1d   : > { %v192_v36 = vrot.slane %v164_v28, %v1265_v9  ;;  %v194_v37 = vcombine.high %v178_v29, %v178_v29  ;;  %v1289_v38 = vrot.slane %v235_v30, %v1265_v9  ;;  %v265_v39 = vcombine.high %v249_v31, %v249_v31 }
  0x1e   : > { %v490_v40 = vcombine.low %v171_v25, %v185_v32  ;;  %v1097_v41 = vcombine.high %v171_v25, %v185_v32  ;;  %v195_v42 = vcombine.high %v185_v32, %v185_v32  ;;  %v290_v43 = vcombine.low %v185_v32, %v193_v33 }
  0x1f   : > { %v492_v44 = vcombine.low %v178_v29, %v192_v36  ;;  %v1098_v45 = vcombine.high %v178_v29, %v192_v36  ;;  %v196_v46 = vcombine.high %v192_v36, %v192_v36  ;;  %v292_v47 = vcombine.low %v192_v36, %v194_v37 }
  0x20   : > { %v500_v48 = vrot.slane %v490_v40, %v1265_v9  ;;  %v507_v49 = vrot.slane %v1097_v41, %v1265_v9  ;;  %v291_v50 = vcombine.low %v195_v42, %v178_v29  ;;  %v300_v51 = vrot.slane %v290_v43, %v1265_v9 }
  0x21   : > { %v514_v52 = vrot.slane %v492_v44, %v1265_v9  ;;  %v521_v53 = vrot.slane %v1098_v45, %v1265_v9  ;;  %v293_v54 = vcombine.low %v196_v46, %v211_v17  ;;  %v314_v55 = vrot.slane %v292_v47, %v1265_v9 }
  0x22   : > { %v522_v56 = vcombine.low %v500_v48, %v507_v49  ;;  %v307_v57 = vrot.slane %v291_v50, %v1265_v9  ;;  %v266_v58 = vcombine.high %v256_v34, %v256_v34  ;;  %v539_v59 = vcombine.low %v211_v17, %v242_v27 }
  0x23   : > { %v523_v60 = vcombine.low %v514_v52, %v521_v53  ;;  %v321_v61 = vrot.slane %v293_v54, %v1265_v9  ;;  %v540_v62 = vcombine.low %v256_v34, %v264_v35  ;;  %v542_v63 = vcombine.low %v1289_v38, %v265_v39 }
  0x24   : > { %v530_v0 = vrot.slane %v522_v56, %v1265_v9  ;;  %v322_v1 = vcombine.low %v300_v51, %v307_v57  ;;  %v541_v2 = vcombine.low %v266_v58, %v249_v31  ;;  %v549_v4 = vrot.slane %v539_v59, %v1265_v9 }
  0x25   : > { %v537_v5 = vrot.slane %v523_v60, %v1265_v9  ;;  %v323_v7 = vcombine.low %v314_v55, %v321_v61  ;;  %v556_v8 = vrot.slane %v540_v62, %v1265_v9  ;;  %v570_v10 = vrot.slane %v542_v63, %v1265_v9 }
  0x26   : > { %v330_v11 = vrot.slane %v322_v1, %v1265_v9  ;;  %v563_v12 = vrot.slane %v541_v2, %v1265_v9  ;;  %v339_v13 = vcombine.low %v218_v22, %v256_v34  ;;  %v1092_v14 = vcombine.high %v242_v27, %v256_v34 }
  0x27   : > { %v538_v16 = vcombine.low %v530_v0, %v537_v5  ;;  %v337_v17 = vrot.slane %v323_v7, %v1265_v9  ;;  %v571_v18 = vcombine.low %v549_v4, %v556_v8  ;;  %v341_v20 = vcombine.low %v249_v31, %v1289_v38 }
  0x28   : > { %v572_v21 = vcombine.low %v563_v12, %v570_v10  ;;  %v1093_v24 = vcombine.high %v249_v31, %v1289_v38  ;;  %v349_v25 = vrot.slane %v339_v13, %v1265_v9  ;;  %v356_v26 = vrot.slane %v1092_v14, %v1265_v9 }
  0x29   : > { %1132 = vmatmul.mubr.msk.f32.vlgmr.msra.gmra.mrb[0].mxu0 %vm403_vm1, %v538_v16  ;;  %v338_v28 = vcombine.low %v330_v11, %v337_v17  ;;  %v579_v29 = vrot.slane %v571_v18, %v1265_v9  ;;  %v363_v22 = vrot.slane %v341_v20, %v1265_v9  ;;  %v289_v27 = vrot.slane %v275_v19, %v1265_v9 }
  0x2a   : > { %1134 = vmatprep.mubr.msk.f32.mxu0 %vm1198_vm0, %v1197_v3  ;;  %v586_v30 = vrot.slane %v572_v21, %v1265_v9  ;;  %v370_v31 = vrot.slane %v1093_v24, %v1265_v9  ;;  %v371_v32 = vcombine.low %v349_v25, %v356_v26  ;;  %v267_v33 = vcombine.high %v1289_v38, %v1289_v38 }
  0x2b   : > { %1121 = vmatmul.mubr.msk.f32.vlgmr.msra.gmra.mrb[0].mxu1 %vm403_vm1, %v338_v28  ;;  %v388_v34 = vcombine.low %v1279_v23, %v289_v27  ;;  %v814_v45 = vadd.s32 8, %v1257_v6  ;;  %v816_v48 = vstv %s1102_s27 }
  0x2c   : > { %1123 = vmatprep.mubr.msk.f32.mxu1 %vm1198_vm0, %v1197_v3  ;;  %v587_v15 = vcombine.low %v579_v29, %v586_v30  ;;  %v372_v19 = vcombine.low %v363_v22, %v370_v31  ;;  %v379_v35 = vrot.slane %v371_v32, %v1265_v9  ;;  %v588_v36 = vcombine.low %v267_v33, %v1279_v23 }
  0x2d   : > { %v395_v38 = vrot.slane %v388_v34, %v1265_v9  ;;  %v818_v53 = vadd.s32 %v816_v48, %v814_v45  ;;  %v817_v55 = vadd.s32 %v816_v48, %v1257_v6 }
  0x2e   : > { %1135 = vmatmul.mubr.msk.f32.gmra.mrb[2].mxu0 %vm403_vm1, %v587_v15  ;;  %v386_v37 = vrot.slane %v372_v19, %v1265_v9  ;;  %v595_v39 = vrot.slane %v588_v36, %v1265_v9 }
  0x2f   : > { %1137 = vmatprep.mubr.msk.f32.mxu0 %vm1198_vm0, %v1197_v3  ;;  %v402_v42 = vrot.slane %v395_v38, %v1265_v9  ;;  %vm820_vm2 = vcmp.ge.s32.totalorder %v818_v53, 0  ;;  %vm819_vm3 = vcmp.ge.s32.totalorder %v817_v55, 0  ;;  %vm822_vm4 = vcmp.lt.s32.totalorder %v818_v53, 17 }
  0x30   : > { %v387_v40 = vcombine.low %v379_v35, %v386_v37  ;;  %v602_v41 = vrot.slane %v595_v39, %v1265_v9  ;;  %vm821_vm5 = vcmp.lt.s32.totalorder %v817_v55, 17  ;;  %vm1370_vm6 = vmand %vm820_vm2, %vm822_vm4 }
  0x31   : > { %vm1379_vm7 = vmand %vm819_vm3, %vm821_vm5 }
  0x32   : > { %1124 = vmatmul.mubr.msk.f32.gmra.mrb[2].mxu1 %vm403_vm1, %v387_v40  ;;  %1138 = vmatmul.mubr.msk.f32.gmra.mrb[4].mxu0 %vm403_vm1, %v602_v41 }
  0x33   : > { %1126 = vmatprep.mubr.msk.f32.mxu1 %vm1198_vm0, %v1197_v3 }
  0x36   : > { %1127 = vmatmul.mubr.msk.f32.gmra.mrb[4].mxu1 %vm403_vm1, %v402_v42 }
  0xfc   : > { %v675_v23 = vpop.f32.mrb[0].mxu0 }
  0xfd   : > { %v1133_v43 = vpop.f32.mrb[1].mxu0 }
  0xfe   : > { %v476_v44 = vpop.f32.mrb[0].mxu1 }
  0xff   : > { %v676_v46 = vadd.f32 %v675_v23, %v476_v44  ;;  %v1122_v47 = vpop.f32.mrb[1].mxu1 }
 0x101   : > { %v692_v49 = vcombine.high %v676_v46, %v676_v46  ;;  %v699_v50 = vrot.slane %v676_v46, %v1265_v9  ;;  %v680_v51 = vpop.f32.mrb[2].mxu0 }
 0x102   : > { %v1136_v52 = vpop.f32.mrb[3].mxu0 }
 0x103   : > { %v706_v3 = vrot.slane %v692_v49, %v1265_v9  ;;  %v707_v54 = vcombine.high %v699_v50, %v699_v50  ;;  %v715_v57 = vrot.slane %v699_v50, %v1265_v9 }
 0x105   : > { %v708_v56 = vcombine.high %v706_v3, %v706_v3  ;;  %v729_v58 = vrot.slane %v707_v54, %v1265_v9  ;;  %v481_v59 = vpop.f32.mrb[2].mxu1  ;;  %v685_v60 = vpop.f32.mrb[4].mxu0  ;;  %v722_v0 = vrot.slane %v706_v3, %v1265_v9 }
 0x106   : > { %v681_v61 = vadd.f32 %v680_v51, %v481_v59  ;;  %v1125_v62 = vpop.f32.mrb[3].mxu1  ;;  %v1139_v63 = vpop.f32.mrb[5].mxu0 }
 0x107   : > { %v736_v1 = vrot.slane %v708_v56, %v1265_v9  ;;  %v829_v2 = vcombine.low %v715_v57, %v729_v58  ;;  %v1103_v4 = vcombine.high %v715_v57, %v729_v58 }
 0x108   : > { %v741_v5 = vcombine.high %v681_v61, %v681_v61  ;;  %v748_v6 = vrot.slane %v681_v61, %v1265_v9 }
 0x109   : > { %v831_v7 = vcombine.low %v722_v0, %v736_v1  ;;  %v1104_v8 = vcombine.high %v722_v0, %v736_v1  ;;  %v839_v10 = vrot.slane %v829_v2, %v1265_v9  ;;  %v846_v11 = vrot.slane %v1103_v4, %v1265_v9  ;;  %v486_v12 = vpop.f32.mrb[4].mxu1 }
 0x10a   : > { %v755_v13 = vrot.slane %v741_v5, %v1265_v9  ;;  %v756_v14 = vcombine.high %v748_v6, %v748_v6  ;;  %v764_v16 = vrot.slane %v748_v6, %v1265_v9  ;;  %v686_v17 = vadd.f32 %v685_v60, %v486_v12  ;;  %v1128_v18 = vpop.f32.mrb[5].mxu1 }
 0x10b   : > { %v853_v20 = vrot.slane %v831_v7, %v1265_v9  ;;  %v860_v21 = vrot.slane %v1104_v8, %v1265_v9  ;;  %v861_v24 = vcombine.low %v839_v10, %v846_v11 }
 0x10c   : > { %v757_v25 = vcombine.high %v755_v13, %v755_v13  ;;  %v771_v26 = vrot.slane %v755_v13, %v1265_v9  ;;  %v778_v28 = vrot.slane %v756_v14, %v1265_v9  ;;  %v786_v29 = vcombine.high %v764_v16, %v764_v16 }
 0x10d   : > { %v884_v22 = vrot.slane %v764_v16, %v1265_v9  ;;  %v796_v27 = vrot.slane %v686_v17, %v1265_v9  ;;  %v862_v30 = vcombine.low %v853_v20, %v860_v21  ;;  %v869_v31 = vrot.slane %v861_v24, %v1265_v9 }
 0x10e   : > { %v785_v32 = vrot.slane %v757_v25, %v1265_v9  ;;  %v787_v33 = vcombine.high %v771_v26, %v771_v26  ;;  %v788_v34 = vcombine.high %v778_v28, %v778_v28  ;;  %v892_v15 = vcombine.low %v778_v28, %v786_v29 }
 0x10f   : > { %v797_v35 = vcombine.high %v796_v27, %v796_v27  ;;  %v804_v36 = vrot.slane %v796_v27, %v1265_v9  ;;  %v876_v37 = vrot.slane %v862_v30, %v1265_v9  ;;  %v891_v38 = vrot.slane %v884_v22, %v1265_v9 }
 0x110   : > { %v893_v39 = vcombine.low %v788_v34, %v771_v26  ;;  %v894_v40 = vcombine.low %v785_v32, %v787_v33  ;;  %v789_v41 = vcombine.high %v785_v32, %v785_v32  ;;  %v902_v45 = vrot.slane %v892_v15, %v1265_v9 }
 0x111   : > { %v811_v23 = vrot.slane %v797_v35, %v1265_v9  ;;  %v877_v43 = vcombine.low %v869_v31, %v876_v37  ;;  %v960_v44 = vsel %vm1370_vm6, %v891_v38, 0.0 }
 0x112   : > { %v909_v46 = vrot.slane %v893_v39, %v1265_v9  ;;  %v895_v47 = vcombine.low %v789_v41, %v804_v36  ;;  %v916_v52 = vrot.slane %v894_v40, %v1265_v9 }
 0x113   : > { %v959_v48 = vsel %vm1379_vm7, %v877_v43, 0.0  ;;  %v947_v49 = vrot.slane %v811_v23, %v1265_v9 }
 0x114   : > { %v923_v50 = vrot.slane %v895_v47, %v1265_v9  ;;  %v969_v51 = vrot.slane %v959_v48, 7  ;;  %v924_v53 = vcombine.low %v902_v45, %v909_v46 }
 0x115   : > { %v954_v3 = vrot.slane %v947_v49, %v1265_v9 }
 0x116   : > { %971 = vrot.lane.b32.xlu0 %v969_v51, %s1200_s28  ;;  %v925_v54 = vcombine.low %v916_v52, %v923_v50  ;;  %v932_v56 = vrot.slane %v924_v53, %v1265_v9 }
 0x117   : > { %v962_v55 = vsel %vm1370_vm6, %v954_v3, 0.0 }
 0x118   : > { %v939_v57 = vrot.slane %v925_v54, %v1265_v9 }
 0x11a   : > { %v940_v58 = vcombine.low %v932_v56, %v939_v57 }
 0x11c   : > { %v961_v59 = vsel %vm1379_vm7, %v940_v58, 0.0 }
 0x11d   : > { %v970_v60 = vrot.slane %v961_v59, 7 }
 0x11f   : > { %973 = vrot.lane.b32.xlu0 %v970_v60, %s1200_s28 }
 0x188   : > { %v972_v61 = vpop.permute.xlu0 %971 }
 0x189   : > { %v977_v62 = vadd.f32 %v972_v61, %v959_v48  ;;  %v978_v63 = vadd.f32 %v972_v61, %v960_v44 }
 0x18b   : > { %982 = vst.msk [vmem:[%s132_s3 - $0x1] sm:$0xfe] %vm981_vm8, %v977_v62 }
 0x18c   : > { %984 = vst.msk [vmem:[%s132_s3 + $0x7] sm:$0x1] %vm983_vm9, %v978_v63 }
 0x18f   : > { %993 = sbr.rel (!%p1241_p4) target bundleno = 414 (0x19e), region = 32 }
 0x191   : > { %v974_v0 = vpop.permute.xlu0 %973 }
 0x192   : > { %v979_v1 = vadd.f32 %v974_v0, %v961_v59  ;;  %v980_v2 = vadd.f32 %v974_v0, %v962_v55 }
 0x193   : > { %v1025_v9 = vld [vmem:[%s132_s3] sm:$0xff] (%p1241_p4) }
 0x194   : > { %985 = vst.msk [vmem:[%s132_s3 + $0x7] sm:$0xfe] %vm981_vm8, %v979_v1  ;;  %1026 = vst [vmem:[%s995_s6] sm:$0xff] (%p1241_p4), %v1025_v9 }
 0x195   : > { %986 = vst.msk [vmem:[%s132_s3 + $0xf] sm:$0x1] %vm983_vm9, %v980_v2 }
 0x19c   : > { %v1027_v4 = vld [vmem:[%s132_s3 + $0x8] sm:$0xff] }
 0x19d   : > { %1028 = vst [vmem:[%s995_s6 + $0x10] sm:$0xff] %v1027_v4 }
 0x19e PF: > { %p9_p8 = scmp.ge.s32.totalorder %s1231_s13, 4   ;;  %s1426_s9 = smov %s1191_s10 }
 0x19f   : > { %s1427_s10 = smov %s1239_s16  ;;  %s1428_s11 = smov %s1231_s13 }
 0x1a0   :  { %11 = sbr.rel (!%p9_p8) target bundleno = 2 (0x2), region = 96 }

</bundles_post_ra>
